<compile_context>
chip_gen: v7x
topology: tpu7x:2x2x1
jax: 0.10.0
libtpu: 0.0.40
codegen_flags: <defaults>
</compile_context>

<pallas_src>
import functools
import math

import numpy as np
import jax
import jax.numpy as jnp
from jax.experimental import pallas as pl
from jax.experimental.pallas import tpu as pltpu

_MIB = 1024 * 1024


# --------------------------------------------------------------------------- #
# Helpers                                                                     #
# --------------------------------------------------------------------------- #
def _round_up(v, m):
    return ((v + m - 1) // m) * m


def _hadamard_matrix(n):
    """Sylvester Hadamard matrix H_n (entries +/-1), n a power of two."""
    assert n > 0 and (n & (n - 1)) == 0, "full online Hadamard needs power-of-2 dim"
    H = np.array([[1.0]], dtype=np.float32)
    while H.shape[0] < n:
        H = np.block([[H, H], [H, -H]])
    return H


def _tpu_config():
    """(vmem_capacity_bytes, tm_target, tn_target) per TPU generation."""
    try:
        kind = jax.devices()[0].device_kind.lower()
    except Exception:
        kind = ""
    if "v6" in kind:
        # v6e: 128 MiB VMEM, 256-wide MXU, ~650 bf16 flops/HBM byte roofline
        # -> large row blocks so the weight stream is amortized.
        return 128 * _MIB, 512, 256
    if "v5" in kind:
        # v5e: 128 MiB VMEM but 128-wide MXU tiles; tn=128 halves the wt DMA.
        return 128 * _MIB, 256, 128
    # v7x (64 MiB VMEM/TC) and unknown chips: conservative defaults.
    return 64 * _MIB, 256, 256


def _vmem_estimate(tm, tn, k, k_blk, x_bytes, w_bytes, out_bytes, has_bias, rotate):
    """Rough VMEM footprint of the fused kernel (double buffers + scratch +
    f32 rotation temporaries + compiler headroom left to the caller)."""
    est = 2 * tm * k * x_bytes          # x row block (double-buffered)
    est += 2 * k * tn * w_bytes         # weight.T tile (double-buffered)
    est += 2 * tm * tn * out_bytes      # output tile (double-buffered)
    if has_bias:
        est += 2 * tn * 4               # f32 bias tile
    if rotate:
        est += 2 * k_blk * k_blk * x_bytes   # H block (tiny, <=128 KiB each)
        est += tm * k * x_bytes              # rotated-activation scratch
        est += 2 * tm * k * 4                # f32 rotation temporaries
    return est


# --------------------------------------------------------------------------- #
# Kernel bodies                                                               #
# --------------------------------------------------------------------------- #
def _rotate_block(x, h_blk, *, k_blk, k_grp, h_scale, out_dtype):
    """Full online Hadamard rotation of a (rows, K) activation block.

    Factored as H_K = H_{k_grp} (kron) H_{k_blk}:
      stage 1: per-k_blk-column-block matmul with H_{k_blk} (MXU, f32 acc)
      stage 2: log2(k_grp) FWHT butterfly add/sub stages across blocks (VPU,
               static lane-aligned slices).
    Scale and cast back to x dtype at the end (fp32_had semantics).
    """
    if k_grp == 1:
        r = jnp.dot(x, h_blk, preferred_element_type=jnp.float32)
    else:
        k = k_blk * k_grp
        r = jnp.concatenate(
            [jnp.dot(x[:, g * k_blk:(g + 1) * k_blk], h_blk,
                     preferred_element_type=jnp.float32)
             for g in range(k_grp)],
            axis=-1)
        h = k_blk
        while h < k:
            pieces = []
            for base in range(0, k, 2 * h):
                a = r[:, base:base + h]
                b = r[:, base + h:base + 2 * h]
                pieces.append(a + b)
                pieces.append(a - b)
            r = jnp.concatenate(pieces, axis=-1)
            h *= 2
    return (r * h_scale).astype(out_dtype)


def _fused_rotate_linear_kernel(*refs, k_blk, k_grp, h_scale, has_bias):
    # refs: x (tm,K), h (k_blk,k_blk), wt (K,tn), [bias (1,tn) f32], out (tm,tn),
    #       xr scratch (tm,K)
    if has_bias:
        x_ref, h_ref, wt_ref, b_ref, o_ref, xr_ref = refs
    else:
        x_ref, h_ref, wt_ref, o_ref, xr_ref = refs
        b_ref = None

    # Rotation computed once per row block (inner N axis is "arbitrary"),
    # reused for every N tile from the VMEM scratch.
    @pl.when(pl.program_id(1) == 0)
    def _():
        xr_ref[...] = _rotate_block(x_ref[...], h_ref[...], k_blk=k_blk,
                                    k_grp=k_grp, h_scale=h_scale,
                                    out_dtype=xr_ref.dtype)

    acc = jnp.dot(xr_ref[...], wt_ref[...], preferred_element_type=jnp.float32)
    if has_bias:
        acc = acc + b_ref[...]
    o_ref[...] = acc.astype(o_ref.dtype)


def _rotate_kernel(x_ref, h_ref, xr_ref, *, k_blk, k_grp, h_scale):
    xr_ref[...] = _rotate_block(x_ref[...], h_ref[...], k_blk=k_blk,
                                k_grp=k_grp, h_scale=h_scale,
                                out_dtype=xr_ref.dtype)


def _linear_kernel(*refs, has_bias):
    if has_bias:
        x_ref, wt_ref, b_ref, o_ref = refs
    else:
        x_ref, wt_ref, o_ref = refs
        b_ref = None
    acc = jnp.dot(x_ref[...], wt_ref[...], preferred_element_type=jnp.float32)
    if has_bias:
        acc = acc + b_ref[...]
    o_ref[...] = acc.astype(o_ref.dtype)


# --------------------------------------------------------------------------- #
# pallas_call wrappers                                                        #
# --------------------------------------------------------------------------- #
def _call_fused(x2, h_blk, wt, bias, *, tm, tn, k_blk, k_grp, h_scale,
                has_bias, vmem_limit):
    mp, k = x2.shape
    np_padded = wt.shape[1]
    kernel = functools.partial(_fused_rotate_linear_kernel, k_blk=k_blk,
                               k_grp=k_grp, h_scale=h_scale, has_bias=has_bias)
    in_specs = [
        pl.BlockSpec((tm, k), lambda i, j: (i, 0)),          # activations
        pl.BlockSpec((k_blk, k_blk), lambda i, j: (0, 0)),   # H block (resident)
        pl.BlockSpec((k, tn), lambda i, j: (0, j)),          # weight.T tile
    ]
    args = [x2, h_blk, wt]
    if has_bias:
        in_specs.append(pl.BlockSpec((1, tn), lambda i, j: (0, j)))
        args.append(bias)
    return pl.pallas_call(
        kernel,
        out_shape=jax.ShapeDtypeStruct((mp, np_padded), x2.dtype),
        grid_spec=pltpu.PrefetchScalarGridSpec(
            num_scalar_prefetch=0,
            grid=(mp // tm, np_padded // tn),
            in_specs=in_specs,
            out_specs=pl.BlockSpec((tm, tn), lambda i, j: (i, j)),
            scratch_shapes=[pltpu.VMEM((tm, k), x2.dtype)]),
        compiler_params=pltpu.CompilerParams(
            dimension_semantics=("parallel", "arbitrary"),
            vmem_limit_bytes=vmem_limit),
    )(*args)


def _call_rotate(x2, h_blk, *, k_blk, k_grp, h_scale, vmem_limit):
    mp, k = x2.shape
    kernel = functools.partial(_rotate_kernel, k_blk=k_blk, k_grp=k_grp,
                               h_scale=h_scale)
    return pl.pallas_call(
        kernel,
        out_shape=jax.ShapeDtypeStruct((mp, k), x2.dtype),
        grid_spec=pltpu.PrefetchScalarGridSpec(
            num_scalar_prefetch=0,
            grid=(1,),
            in_specs=[pl.BlockSpec((mp, k), lambda i: (0, 0)),
                      pl.BlockSpec((k_blk, k_blk), lambda i: (0, 0))],
            out_specs=pl.BlockSpec((mp, k), lambda i: (0, 0))),
        compiler_params=pltpu.CompilerParams(
            dimension_semantics=("arbitrary",),
            vmem_limit_bytes=vmem_limit),
    )(x2, h_blk)


def _call_linear(x2, wt, bias, *, tm, tn, has_bias, vmem_limit):
    mp, k = x2.shape
    np_padded = wt.shape[1]
    kernel = functools.partial(_linear_kernel, has_bias=has_bias)
    in_specs = [
        pl.BlockSpec((tm, k), lambda i, j: (i, 0)),
        pl.BlockSpec((k, tn), lambda i, j: (0, j)),
    ]
    args = [x2, wt]
    if has_bias:
        in_specs.append(pl.BlockSpec((1, tn), lambda i, j: (0, j)))
        args.append(bias)
    return pl.pallas_call(
        kernel,
        out_shape=jax.ShapeDtypeStruct((mp, np_padded), x2.dtype),
        grid_spec=pltpu.PrefetchScalarGridSpec(
            num_scalar_prefetch=0,
            grid=(mp // tm, np_padded // tn),
            in_specs=in_specs,
            out_specs=pl.BlockSpec((tm, tn), lambda i, j: (i, j))),
        compiler_params=pltpu.CompilerParams(
            # No cross-step scratch carry here, so both axes can shard across
            # TensorCores (covers decode-shaped inputs on v7x).
            dimension_semantics=("parallel", "parallel"),
            vmem_limit_bytes=vmem_limit),
    )(*args)


# --------------------------------------------------------------------------- #
# Load-time prep + forward                                                    #
# --------------------------------------------------------------------------- #
def prepare_rotate_linear(weight, bias, in_features, *, online_full_had=True,
                          online_partial_had=False, K=1, fp32_had=True):
    """One-time (load-time) parameter prep: weight transpose, N padding to a
    multiple of 128 (lane-dense output stores), bias up-cast, Hadamard block
    construction.  Keep this OUT of the per-call hot path."""
    assert not online_partial_had, "TODO(synk): online_partial_had not implemented"
    n_out, k_in = weight.shape
    assert k_in == in_features

    n_pad = (-n_out) % 128
    w = jnp.asarray(weight)
    if n_pad:
        w = jnp.pad(w, ((0, n_pad), (0, 0)))
    wt = w.T                                        # (K, Np), done once

    if bias is None:
        b = None
    else:
        b = jnp.asarray(bias, jnp.float32).reshape(1, n_out)
        if n_pad:
            b = jnp.pad(b, ((0, 0), (0, n_pad)))

    if online_full_had:
        assert K == 1, "TODO(synk): K>1 factorized (had_K kron H) path not implemented"
        assert in_features & (in_features - 1) == 0, \
            "full online Hadamard needs power-of-2 in_features"
        # TODO(synk): fp32_had=False (rotation in x dtype) numerics not modeled;
        # the kernel always accumulates the rotation in f32.
        k_blk = min(in_features, 256)
        k_grp = in_features // k_blk
        h_blk = jnp.asarray(_hadamard_matrix(k_blk), jnp.bfloat16)  # +/-1, exact
        h_scale = 1.0 / math.sqrt(in_features)
        rotate = True
    else:
        k_blk, k_grp, h_blk, h_scale, rotate = 0, 0, None, 1.0, False

    return dict(wt=wt, bias=b, h_blk=h_blk, h_scale=h_scale, k_blk=k_blk,
                k_grp=k_grp, rotate=rotate, in_features=in_features,
                out_features=n_out)


def rotate_linear_forward(x, params, *, tm=None, tn=None):
    """x: (..., in_features) -> (..., out_features), dtype preserved."""
    lead = x.shape[:-1]
    k = x.shape[-1]
    assert k == params["in_features"]
    wt, bias = params["wt"], params["bias"]
    np_padded = wt.shape[1]
    n_out = params["out_features"]
    rotate = params["rotate"]
    k_blk, k_grp, h_scale = params["k_blk"], params["k_grp"], params["h_scale"]
    has_bias = bias is not None

    x2 = x.reshape(-1, k)
    m = x2.shape[0]

    vmem_cap, tm_target, tn_target = _tpu_config()

    if tn is None:
        tn = tn_target if np_padded % tn_target == 0 else 128
    assert np_padded % tn == 0

    if tm is None:
        tm = min(tm_target, _round_up(max(m, 16), 16))
    tm = _round_up(tm, 16)

    x_bytes = x2.dtype.itemsize
    w_bytes = wt.dtype.itemsize
    out_bytes = x2.dtype.itemsize
    budget = int(0.80 * vmem_cap)
    while tm > 16 and _vmem_estimate(tm, tn, k, k_blk, x_bytes, w_bytes,
                                     out_bytes, has_bias, rotate) > budget:
        tm = max(16, _round_up(tm // 2, 16))

    pad_m = (-m) % tm
    if pad_m:
        x2 = jnp.pad(x2, ((0, pad_m), (0, 0)))
    mp = x2.shape[0]
    n_row_blocks = mp // tm

    est = _vmem_estimate(tm, tn, k, k_blk, x_bytes, w_bytes, out_bytes,
                         has_bias, rotate)
    vmem_limit = min(int(0.85 * vmem_cap), max(32 * _MIB, int(est * 1.5)))

    if rotate:
        h_blk = params["h_blk"].astype(x2.dtype)   # +/-1 entries: exact cast
        if n_row_blocks >= 2:
            out = _call_fused(x2, h_blk, wt, bias, tm=tm, tn=tn, k_blk=k_blk,
                              k_grp=k_grp, h_scale=h_scale, has_bias=has_bias,
                              vmem_limit=vmem_limit)
        else:
            # Decode-shaped input (single row block): rotate in a tiny
            # standalone kernel, then run the linear with N as a parallel grid
            # axis so v7x's second TensorCore gets work.
            xr = _call_rotate(x2, h_blk, k_blk=k_blk, k_grp=k_grp,
                              h_scale=h_scale, vmem_limit=vmem_limit)
            out = _call_linear(xr, wt, bias, tm=mp, tn=tn, has_bias=has_bias,
                               vmem_limit=vmem_limit)
    else:
        out = _call_linear(x2, wt, bias, tm=tm, tn=tn, has_bias=has_bias,
                           vmem_limit=vmem_limit)

    out = out[:m, :n_out]
    return out.reshape(*lead, n_out)


# --------------------------------------------------------------------------- #
# Pure-JAX reference + self-test                                              #
# --------------------------------------------------------------------------- #
def _reference(x, weight, bias, in_features, *, rotate=True):
    """Matches RotateLinear.forward (full online Hadamard, K==1, fp32_had)."""
    xr = x
    if rotate:
        H = jnp.asarray(_hadamard_matrix(in_features))           # f32, +/-1
        scale = 1.0 / math.sqrt(in_features)
        xr = (x.astype(jnp.float32) @ H) * scale
        xr = xr.astype(x.dtype)
    y = jnp.einsum("...k,nk->...n", xr.astype(jnp.float32),
                   weight.astype(jnp.float32))
    if bias is not None:
        y = y + bias.astype(jnp.float32)
    return y.astype(x.dtype)


if __name__ == "__main__":
    key = jax.random.PRNGKey(0)
    k1, k2, k3, k4, k5 = jax.random.split(key, 5)

    # --- Test 1: fused path (multiple row blocks), bias, K == k_blk ---------
    B, S, IN, OUT = 2, 32, 128, 256
    x = jax.random.normal(k1, (B, S, IN), jnp.float32).astype(jnp.bfloat16)
    w = (jax.random.normal(k2, (OUT, IN), jnp.float32) * 0.05).astype(jnp.bfloat16)
    b = (jax.random.normal(k3, (OUT,), jnp.float32) * 0.1).astype(jnp.bfloat16)

    params = prepare_rotate_linear(w, b, IN, online_full_had=True, K=1)
    y = jax.block_until_ready(rotate_linear_forward(x, params, tm=16, tn=128))
    y_ref = _reference(x, w, b, IN)
    assert y.shape == (B, S, OUT) and y.dtype == x.dtype
    assert jnp.allclose(y.astype(jnp.float32), y_ref.astype(jnp.float32),
                        atol=2e-2, rtol=2e-2)

    # --- Test 2: decode-shaped path, factored cross-block Hadamard (K>256),
    #             no bias, out_features not a multiple of 128 ---------------
    B2, S2, IN2, OUT2 = 2, 8, 512, 320
    x2 = jax.random.normal(k4, (B2, S2, IN2), jnp.float32).astype(jnp.bfloat16)
    w2 = (jax.random.normal(k5, (OUT2, IN2), jnp.float32) * 0.03).astype(jnp.bfloat16)

    params2 = prepare_rotate_linear(w2, None, IN2, online_full_had=True, K=1)
    y2 = jax.block_until_ready(rotate_linear_forward(x2, params2))
    y2_ref = _reference(x2, w2, None, IN2)
    assert y2.shape == (B2, S2, OUT2) and y2.dtype == x2.dtype
    assert jnp.allclose(y2.astype(jnp.float32), y2_ref.astype(jnp.float32),
                        atol=2e-2, rtol=2e-2)

    # --- Test 3: rotation disabled -> plain linear ---------------------------
    params3 = prepare_rotate_linear(w, b, IN, online_full_had=False, K=1)
    y3 = jax.block_until_ready(rotate_linear_forward(x, params3))
    y3_ref = _reference(x, w, b, IN, rotate=False)
    assert jnp.allclose(y3.astype(jnp.float32), y3_ref.astype(jnp.float32),
                        atol=2e-2, rtol=2e-2)

    print("KERNEL_OK")
</pallas_src>

<mosaic_0001>
module attributes {stable_mosaic.version = 11 : i64} {
  func.func @_fused_rotate_linear_kernel(%arg0: i32, %arg1: i32, %arg2: memref<16x128xbf16, #tpu.memory_space<vmem>>, %arg3: memref<128x128xbf16, #tpu.memory_space<vmem>>, %arg4: memref<128x128xbf16, #tpu.memory_space<vmem>>, %arg5: memref<1x128xf32, #tpu.memory_space<vmem>>, %arg6: memref<16x128xbf16, #tpu.memory_space<vmem>>, %arg7: memref<16x128xbf16, #tpu.memory_space<vmem>>) attributes {dimension_semantics = [#tpu.dimension_semantics<parallel>, #tpu.dimension_semantics<arbitrary>], iteration_bounds = array<i64: 4, 2>, scalar_prefetch = 0 : i64, scratch_operands = 1 : i64, tpu.core_type = #tpu.core_type<tc>, window_params = [{transform_indices = @transform_0, window_bounds = array<i64: 16, 128>}, {pipeline_mode = #tpu.pipeline_mode<synchronous>, transform_indices = @transform_1, window_bounds = array<i64: 128, 128>}, {transform_indices = @transform_2, window_bounds = array<i64: 128, 128>}, {transform_indices = @transform_3, window_bounds = array<i64: 1, 128>}, {transform_indices = @transform_4, window_bounds = array<i64: 16, 128>}]} {
    %c0_i32 = arith.constant 0 : i32
    %0 = arith.cmpi eq, %arg1, %c0_i32 : i32
    %1 = arith.extui %0 : i1 to i32
    %c0_i32_0 = arith.constant 0 : i32
    %2 = arith.cmpi ne, %1, %c0_i32_0 : i32
    scf.if %2 {
      %c0_8 = arith.constant 0 : index
      %c0_9 = arith.constant 0 : index
      %11 = vector.load %arg2[%c0_8, %c0_9] : memref<16x128xbf16, #tpu.memory_space<vmem>>, vector<16x128xbf16>
      %c0_10 = arith.constant 0 : index
      %c0_11 = arith.constant 0 : index
      %12 = vector.load %arg3[%c0_10, %c0_11] : memref<128x128xbf16, #tpu.memory_space<vmem>>, vector<128x128xbf16>
      %cst_12 = arith.constant dense<0.000000e+00> : vector<16x128xf32>
      %13 = tpu.matmul %11, %12, %cst_12 {dimension_numbers = #tpu.dot_dimension_numbers<[1], [0], [0], [1], [0, 0, 1, 1], [], []>} : vector<16x128xbf16>, vector<128x128xbf16>, vector<16x128xf32> -> vector<16x128xf32>
      %cst_13 = arith.constant 0.0883883461 : f32
      %14 = vector.broadcast %cst_13 : f32 to vector<16x128xf32>
      %15 = arith.mulf %13, %14 : vector<16x128xf32>
      %16 = arith.truncf %15 : vector<16x128xf32> to vector<16x128xbf16>
      %c0_14 = arith.constant 0 : index
      %c0_15 = arith.constant 0 : index
      %17 = vector.load %arg7[%c0_14, %c0_15] : memref<16x128xbf16, #tpu.memory_space<vmem>>, vector<16x128xbf16>
      tpu.vector_store %arg7[%c0_14, %c0_15], %16 {strides = array<i32>} : memref<16x128xbf16, #tpu.memory_space<vmem>>, vector<16x128xbf16>,
    } else {
    }
    %c0 = arith.constant 0 : index
    %c0_1 = arith.constant 0 : index
    %3 = vector.load %arg7[%c0, %c0_1] : memref<16x128xbf16, #tpu.memory_space<vmem>>, vector<16x128xbf16>
    %c0_2 = arith.constant 0 : index
    %c0_3 = arith.constant 0 : index
    %4 = vector.load %arg4[%c0_2, %c0_3] : memref<128x128xbf16, #tpu.memory_space<vmem>>, vector<128x128xbf16>
    %cst = arith.constant dense<0.000000e+00> : vector<16x128xf32>
    %5 = tpu.matmul %3, %4, %cst {dimension_numbers = #tpu.dot_dimension_numbers<[1], [0], [0], [1], [0, 0, 1, 1], [], []>} : vector<16x128xbf16>, vector<128x128xbf16>, vector<16x128xf32> -> vector<16x128xf32>
    %c0_4 = arith.constant 0 : index
    %c0_5 = arith.constant 0 : index
    %6 = vector.load %arg5[%c0_4, %c0_5] : memref<1x128xf32, #tpu.memory_space<vmem>>, vector<1x128xf32>
    %7 = vector.broadcast %6 : vector<1x128xf32> to vector<16x128xf32>
    %8 = arith.addf %5, %7 : vector<16x128xf32>
    %9 = arith.truncf %8 : vector<16x128xf32> to vector<16x128xbf16>
    %c0_6 = arith.constant 0 : index
    %c0_7 = arith.constant 0 : index
    %10 = vector.load %arg6[%c0_6, %c0_7] : memref<16x128xbf16, #tpu.memory_space<vmem>>, vector<16x128xbf16>
    tpu.vector_store %arg6[%c0_6, %c0_7], %9 {strides = array<i32>} : memref<16x128xbf16, #tpu.memory_space<vmem>>, vector<16x128xbf16>,
    return
  }
  func.func @transform_0(%arg0: i32, %arg1: i32) -> (i32, i32) {
    %c0_i32 = arith.constant 0 : i32
    %c0_i32_0 = arith.constant 0 : i32
    return %arg0, %c0_i32 : i32, i32
  }
  func.func @transform_1(%arg0: i32, %arg1: i32) -> (i32, i32) {
    %c0_i32 = arith.constant 0 : i32
    %c0_i32_0 = arith.constant 0 : i32
    %c0_i32_1 = arith.constant 0 : i32
    return %c0_i32, %c0_i32_0 : i32, i32
  }
  func.func @transform_2(%arg0: i32, %arg1: i32) -> (i32, i32) {
    %c0_i32 = arith.constant 0 : i32
    %c0_i32_0 = arith.constant 0 : i32
    return %c0_i32, %arg1 : i32, i32
  }
  func.func @transform_3(%arg0: i32, %arg1: i32) -> (i32, i32) {
    %c0_i32 = arith.constant 0 : i32
    %c0_i32_0 = arith.constant 0 : i32
    return %c0_i32, %arg1 : i32, i32
  }
  func.func @transform_4(%arg0: i32, %arg1: i32) -> (i32, i32) {
    %c0_i32 = arith.constant 0 : i32
    return %arg0, %arg1 : i32, i32
  }
}

</mosaic_0001>

<bundles_post_ra>
// kernel: tpu_custom_call.1
= control target key start
LH: loop header
LB: loop body
LE: loop exit
PB: predicated region body
PF: predicated region fallthrough
CT: control target
= control target key end

     0   :  { %s1672_s0 = inlined_call_operand.hbm [shape: bf16[64,128], index: 0, kind: input, shape index: {}]   ;;  %s1673_s1 = inlined_call_operand.hbm [shape: bf16[128,128], index: 1, kind: input, shape index: {}]   ;;  %s1674_s2 = inlined_call_operand.hbm [shape: bf16[128,256], index: 2, kind: input, shape index: {}]   ;;  %s1675_s3 = inlined_call_operand.vmem [shape: f32[1,256], index: 3, kind: input, shape index: {}]   ;;  %s1676_s4 = inlined_call_operand.hbm [shape: bf16[64,256], index: 4, kind: output, shape index: {}]  }
   0x1   :  { %1697 = sst [smem:[#allocation25_spill]] %s1672_s0 }
   0x2   :  { %1698 = sst [smem:[#allocation26_spill]] %s1675_s3 }
   0x3   :  { %1699 = sst [smem:[#allocation27_spill]] %s1676_s4 }
   0x4   :  { %9 = vsyncpa [#allocation4], 0 }
   0x5   :  { %11 = vsyncpa [#allocation4 + $0x1], 0 }
   0x6   :  { %12 = vsyncpa [#allocation7], 0 }
   0x7   :  { %13 = vsyncpa [#allocation5], 0 }
   0x8   :  { %15 = vsyncpa [#allocation5 + $0x1], 0  ;;  %s1244_s15 = smov 0   ;;  %s1246_s16 = smov 0  }
   0x9   :  { %s1248_s17 = smov 0   ;;  %s1250_s18 = smov 0  }
   0xa   :  { %s1252_s19 = smov 0   ;;  %s1254_s20 = smov 0  }
   0xb   :  { %s1256_s21 = smov 0   ;;  %s1258_s22 = smov 0  }
   0xc   :  { %s1260_s23 = smov 0   ;;  %s1262_s24 = smov 0  }
   0xd   :  { %s1264_s25 = smov 0   ;;  %s1266_s26 = smov 0  }
   0xe   :  { %s1268_s27 = smov 0   ;;  %s1270_s28 = smov 0  }
   0xf LB: > { %1700 = sst [smem:[#allocation14_spill]] %s1171_s20  ;;  %s30_s29 = sadd.s32 1, %s1195_s26  ;;  %s1203_s28 = sphi %s1270_s28, %s21_s28   ;;  %s1199_s27 = sphi %s1268_s27, %s1749_s27   ;;  %s1195_s26 = sphi %s1266_s26, %s1748_s26   ;;  %s1191_s25 = sphi %s1264_s25, %s1747_s25   ;;  %s1187_s24 = sphi %s1262_s24, %s1746_s24   ;;  %s1183_s23 = sphi %s1260_s23, %s1745_s23   ;;  %s1179_s22 = sphi %s1258_s22, %s1756_s22   ;;  %s1175_s21 = sphi %s1256_s21, %s1755_s21   ;;  %s1171_s20 = sphi %s1254_s20, %s1743_s20   ;;  %s1167_s19 = sphi %s1252_s19, %s1754_s19   ;;  %s1163_s18 = sphi %s1250_s18, %s1753_s18   ;;  %s1159_s17 = sphi %s1248_s17, %s1752_s17   ;;  %s1155_s16 = sphi %s1246_s16, %s1751_s16   ;;  %s1151_s15 = sphi %s1244_s15, %s1750_s15  }
  0x10   : > { %1701 = sst [smem:[#allocation15_spill]] %s1183_s23  ;;  %s33_s30 = sadd.s32 1, %s1199_s27 }
  0x11   : > { %1702 = sst [smem:[#allocation16_spill]] %s1187_s24  ;;  %p31_p0 = scmp.ge.s32.totalorder %s30_s29, 2 }
  0x12   : > { %1703 = sst [smem:[#allocation17_spill]] %s1191_s25  ;;  %s40_s5 = sadd.s32 1, %s1183_s23 }
  0x13   : > { %1704 = sst [smem:[#allocation18_spill]] %s1195_s26  ;;  %p47_p1 = scmp.ne.s32.totalorder %s1183_s23, %s1179_s22 }
  0x14   : > { %1705 = sst [smem:[#allocation19_spill]] %s1199_s27  ;;  %p1682_p2 = scmp.eq.s32.totalorder %s1203_s28, 0 }
  0x15   : > { %s1758_s29 = smov (%p31_p0, %s30_s29), 0  ;;  %s1760_s30 = smov (!%p31_p0, %s33_s30), %s1199_s27 }
  0x16   : > { %1706 = sst [smem:[#allocation20_spill]] %s1758_s29  ;;  %p1325_p3 = por %p1682_p2, %p47_p1 }
  0x17   : > { %s1331_s7 = ssub.s32 %s1195_s26, %s1758_s29  ;;  %p35_p4 = scmp.ge.s32.totalorder %s1760_s30, 4 }
  0x18   : > { %p85_p5 = scmp.eq.s32.totalorder %s1331_s7, 0  ;;  %s141_s8 = sadd.s32 1, %s1159_s17 }
  0x19   : > { %s1762_s30 = smov (%p35_p4, %s1760_s30), 0  ;;  %p1681_p6 = scmp.lt.s32.totalorder %s1203_s28, 8 }
  0x1a   : > { %1708 = sst [smem:[#allocation21_spill]] %s1762_s30  ;;  %s37_s9 = ssub.s32 %s1199_s27, %s1762_s30 }
  0x1b   : > { %p38_p7 = scmp.eq.s32.totalorder %s37_s9, 0  ;;  %s138_s10 = sor.u32 %s1331_s7, %s37_s9 }
  0x1c   : > { %p139_p8 = scmp.eq.s32.totalorder %s138_s10, 0  ;;  %s191_s11 = sand.u32 1, %s1203_s28  }
  0x1d   : > { %s1343_s12 = scalar_select %p38_p7, %s1183_s23, %s40_s5  }
  0x1e   : > { %s1346_s13 = scalar_select %p139_p8, %s1159_s17, %s141_s8  }
  0x1f   : > { %1709 = sst [smem:[#allocation22_spill]] %s1343_s12  ;;  %s193_s14 = sand.u32 1, %s1183_s23  }
  0x20   : > { %1710 = sst [smem:[#allocation23_spill]] %s1346_s13  ;;  %s688_s29 = sshll.u32 %s193_s14, 3 }
  0x21   : > { %s725_s4 = sshll.u32 %s1199_s27, 7  ;;  %s1711_s0 = sld [smem:[#allocation25_spill]] }
  0x22   : > { %s195_s30 = scalar_lea.vmem [#allocation3], %s688_s29  ;;  %p1359_p9 = pnand %p1681_p6, %p1325_p3 }
  0x23   : > { %s202_s9 = sshll.u32 %s195_s30, 4  ;;  %s1365_s8 = scalar_lea.sflag [#allocation4], %s191_s11  ;;  %s1363_s9 = int_to_ptr.vmem [resolvable:$true] %s202_s9 }
  0x24   : > { %p963_p11 = pneg %p1359_p9 }
  0x27   : > { %s1353_s24 = scalar_lea.hbm %s1711_s0, %s725_s4  ;;  %s966_s29 = scalar_lea.hbm %s1711_s0, 512 }
  0x28   : > { %s961_s3 = scalar_lea.hbm %s1353_s24, 128  ;;  %p967_p0 = scmp.lt.u32.totalorder %s1353_s24, %s1711_s0 }
  0x29   : > { %p962_p10 = scmp.ne.s32.totalorder %s1353_s24, %s961_s3  ;;  %p968_p1 = scmp.lt.u32.totalorder %s966_s29, %s961_s3 }
  0x2a   : > { %p970_p4 = scmp.lt.u32.totalorder %s961_s3, %s1353_s24 }
  0x2b   : > { %p964_p12 = pnand %p963_p11, %p962_p10  ;;  %p969_p3 = por %p968_p1, %p967_p0 }
  0x2d   : > { %p965_p13 = pneg %p964_p12  ;;  %p971_p7 = por %p970_p4, %p969_p3 }
  0x2f   : > { %p972_p8 = pnand %p971_p7, %p965_p13 }
  0x31   : > { %975 = shalt.err (!%p972_p8)
}
  0x32   : > { %s976_s10 = scalar_lea.vmem %s1363_s9, 128  ;;  %s1205_s11 = smov [#allocation3]  }
  0x33   : > { %p977_p10 = scmp.ne.s32.totalorder %s1363_s9, %s976_s10  ;;  %s981_s14 = sshll.u32 %s1205_s11, 4  ;;  %s982_s14 = int_to_ptr.vmem [resolvable:$false] %s981_s14 }
  0x34   : > { %s983_s4 = scalar_lea.vmem %s982_s14, 256  ;;  %p984_p2 = scmp.lt.s32.totalorder %s1363_s9, %s982_s14 }
  0x35   : > { %p979_p12 = pnand %p977_p10, %p963_p11  ;;  %p985_p0 = scmp.lt.s32.totalorder %s983_s4, %s976_s10 }
  0x37   : > { %p980_p6 = pneg %p979_p12  ;;  %p986_p1 = por %p985_p0, %p984_p2 }
  0x39   : > { %p987_p3 = pnand %p986_p1, %p980_p6 }
  0x3b   : > { %990 = shalt.err (!%p987_p3)
}
  0x3c   : > { %s1683_s3 = smov 64   ;;  %s1685_s25 = smov 4  }
  0x3d   : > { %809 = dma.hbm_to_vmem [thread:$0]  (!%p1359_p9), %s1353_s24, 128, %s1363_s9, %s1365_s8, %s1683_s3, %s1683_s3, %s1685_s25  }
  0x3e   : > { %s1397_s29 = sadd.s32 4294967295, %s1203_s28   ;;  %s684_s30 = sadd.s32 4294967294, %s1203_s28  }
  0x3f   : > { %p53_p2 = scmp.ne.s32.totalorder %s1179_s22, %s1175_s21  ;;  %p1691_p6 = scmp.eq.s32.totalorder %s1397_s29, 0 }
  0x40   : > { %s87_s6 = sadd.s32 1, %s1171_s20  ;;  %p94_p11 = scmp.ne.s32.totalorder %s1171_s20, %s1167_s19 }
  0x41   : > { %p1408_p13 = por %p1691_p6, %p53_p2  ;;  %p100_p4 = scmp.ne.s32.totalorder %s1167_s19, %s1163_s18 }
  0x42   : > { %s1417_s24 = scalar_select %p85_p5, %s1171_s20, %s87_s6  }
  0x43   : > { %s1713_s5 = scalar_select %p1408_p13, 1, 0 }
  0x44   : > { %1714 = sst [smem:[#allocation24_spill]] %s1417_s24  ;;  %p1715_p9 = scmp.eq.s32.totalorder %s1203_s28, 0 }
  0x45   : > { %p1427_p8 = por %p100_p4, %p1691_p6  ;;  %p151_p10 = scmp.ne.s32.totalorder %s1159_s17, %s1155_s16 }
  0x46   : > { %p1421_p7 = por %p94_p11, %p1715_p9  ;;  %p152_p12 = scmp.eq.s32.totalorder %s1397_s29, 7 }
  0x47   : > { %s1717_s21 = scalar_select %p1427_p8, 1, 0 }
  0x48   : > { %p157_p0 = scmp.ne.s32.totalorder %s1155_s16, %s1151_s15  ;;  %p158_p1 = scmp.eq.s32.totalorder %s684_s30, 7 }
  0x49   : > { %p1436_p5 = por %p152_p12, %p151_p10  ;;  %p685_p3 = scmp.ge.s32.totalorder %s1203_s28, 1 }
  0x4a   : > { %p1441_p2 = por %p158_p1, %p157_p0  ;;  %p165_p11 = scmp.lt.s32.totalorder %s1203_s28, 9 }
  0x4b   : > { %s1718_s18 = scalar_select %p1436_p5, 1, 0 }
  0x4c   : > { %s1719_s7 = scalar_select %p1441_p2, 1, 0 }
  0x4d   : > { %p1446_p4 = pnand %p685_p3, %p165_p11  ;;  %s1208_s11 = smov [#allocation6]  }
  0x4e   : > { %s177_s14 = sshll.u32 %s1208_s11, 4  ;;  %p1721_p9 = scmp.lt.s32.totalorder %s1203_s28, 8  ;;  %s1450_s14 = int_to_ptr.vmem [resolvable:$true] %s177_s14 }
  0x4f   : > { %s1720_s10 = scalar_select %p1446_p4, 1, 0 }
  0x50   : > { %p1456_p10 = pnand %p1721_p9, %p1421_p7  ;;  %p802_p12 = pneg %p1446_p4 }
  0x51   : > { %s214_s30 = sand.u32 1, %s1171_s20   ;;  %s692_s25 = sshll.u32 %s1195_s26, 6 }
  0x52   : > { %s1722_s4 = scalar_select %p1456_p10, 1, 0 }
  0x53   : > { %s691_s6 = sshll.u32 %s214_s30, 6  ;;  %p1465_p0 = pnand %p802_p12, %p1691_p6 }
  0x54   : > { %s216_s11 = scalar_lea.vmem [#allocation8], %s691_s6  ;;  %s1473_s12 = scalar_lea.hbm %s1674_s2, %s692_s25 }
  0x55   : > { %s222_s0 = sshll.u32 %s216_s11, 4  ;;  %s991_s13 = scalar_lea.hbm %s1673_s1, 1024  ;;  %s1499_s0 = int_to_ptr.vmem [resolvable:$true] %s222_s0 }
  0x56   : > { %p992_p7 = scmp.ne.s32.totalorder %s1673_s1, %s991_s13  ;;  %p993_p1 = pneg %p1465_p0 }
  0x57   : > { %p998_p9 = scmp.lt.u32.totalorder %s991_s13, %s1673_s1 }
  0x58   : > { %p994_p3 = pnand %p993_p1, %p992_p7 }
  0x5a   : > { %p995_p11 = pneg %p994_p3 }
  0x5c   : > { %p1000_p12 = pnand %p998_p9, %p995_p11 }
  0x5e   : > { %1003 = shalt.err (!%p1000_p12)
}
  0x5f   : > { %s1004_s27 = scalar_lea.vmem %s1450_s14, 1024  ;;  %p1012_p8 = scmp.lt.s32.totalorder %s1450_s14, %s1450_s14 }
  0x60   : > { %p1005_p6 = scmp.ne.s32.totalorder %s1450_s14, %s1004_s27  ;;  %p1013_p13 = scmp.lt.s32.totalorder %s1004_s27, %s1004_s27 }
  0x62   : > { %p1007_p2 = pnand %p1005_p6, %p993_p1  ;;  %p1014_p4 = por %p1013_p13, %p1012_p8 }
  0x64   : > { %p1008_p5 = pneg %p1007_p2 }
  0x66   : > { %p1015_p10 = pnand %p1014_p4, %p1008_p5 }
  0x68   : > { %1018 = shalt.err (!%p1015_p10)
}
  0x69   : > { %s1724_s20 = smov 4   ;;  %s1725_s23 = smov 64  }
  0x6a   : > { %805 = dma.hbm_to_vmem [thread:$0]  (!%p1465_p0), %s1673_s1, 1024, %s1450_s14, [#allocation7], %s1725_s23, %s1725_s23, %s1724_s20  }
  0x6b   : > { %s1019_s25 = scalar_lea.hbm %s1473_s12, 1024  ;;  %p1726_p13 = scmp.ne.s32.totalorder %s1722_s4, 0 }
  0x6c   : > { %p1020_p6 = scmp.ne.s32.totalorder %s1473_s12, %s1019_s25  ;;  %s1024_s11 = scalar_lea.hbm %s1674_s2, 2048 }
  0x6d   : > { %p1021_p8 = pneg %p1726_p13  ;;  %p1025_p4 = scmp.lt.u32.totalorder %s1473_s12, %s1674_s2 }
  0x6e   : > { %p1026_p10 = scmp.lt.u32.totalorder %s1024_s11, %s1019_s25  ;;  %p1028_p7 = scmp.lt.u32.totalorder %s1019_s25, %s1473_s12 }
  0x6f   : > { %p1022_p5 = pnand %p1021_p8, %p1020_p6 }
  0x70   : > { %p1027_p0 = por %p1026_p10, %p1025_p4 }
  0x71   : > { %p1023_p2 = pneg %p1022_p5 }
  0x72   : > { %p1029_p1 = por %p1028_p7, %p1027_p0 }
  0x74   : > { %p1030_p3 = pnand %p1029_p1, %p1023_p2 }
  0x76   : > { %1033 = shalt.err (!%p1030_p3)
}
  0x77   : > { %s1034_s14 = scalar_lea.vmem %s1499_s0, 1024  ;;  %s1209_s6 = smov [#allocation8]  }
  0x78   : > { %p1035_p11 = scmp.ne.s32.totalorder %s1499_s0, %s1034_s14  ;;  %s1039_s27 = sshll.u32 %s1209_s6, 4  ;;  %s1040_s27 = int_to_ptr.vmem [resolvable:$false] %s1039_s27 }
  0x79   : > { %s1041_s26 = scalar_lea.vmem %s1040_s27, 2048  ;;  %p1042_p6 = scmp.lt.s32.totalorder %s1499_s0, %s1040_s27 }
  0x7a   : > { %p1037_p9 = pnand %p1035_p11, %p1021_p8  ;;  %p1043_p5 = scmp.lt.s32.totalorder %s1041_s26, %s1034_s14 }
  0x7c   : > { %p1038_p12 = pneg %p1037_p9  ;;  %p1044_p4 = por %p1043_p5, %p1042_p6 }
  0x7e   : > { %p1045_p10 = pnand %p1044_p4, %p1038_p12 }
  0x80   : > { %1048 = shalt.err (!%p1045_p10)
}
  0x81   : > { %s1210_s13 = smov 128   ;;  %p1727_p8 = scmp.ne.s32.totalorder %s1720_s10, 0 }
  0x82   : > { %812 = dma.hbm_to_vmem [thread:$0]  (!%p1726_p13), %s1473_s12, 1024, %s1499_s0, %s1365_s8, %s1210_s13, %s1725_s23, %s1724_s20  }
  0x83   : > { %240 = sbr.rel (%p1727_p8) target bundleno = 673 (0x2a1), region = 36  ;;  %s242_s25 = sand.u32 (!%p1727_p8), 1, %s1397_s29  }
  0x84   : > { %s244_s3 = sand.u32 (!%p1727_p8), 1, %s1179_s22   ;;  %s243_s11 = scalar_lea.sflag (!%p1727_p8), [#allocation4], %s242_s25 }
  0x85   : > { %s1533_s24 = sshll.u32 (!%p1727_p8), %s244_s3, 3  ;;  %p1728_p2 = scmp.ne.s32.totalorder (!%p1727_p8), %s1713_s5, 0 }
  0x86   : > { %s246_s9 = scalar_lea.vmem (!%p1727_p8), [#allocation3], %s1533_s24 }
  0x8a   : > { %1134 = dma.done.wait (%p1728_p2), %s243_s11, 128  }
  0x8b   : > { %1136 = vsyncadd (%p1728_p2), %s243_s11, 4294967168  ;;  %p1729_p13 = scmp.eq.s32.totalorder %s1397_s29, 0 }
  0x8d   : > { %1138 = dma.done.wait (%p1729_p13), [#allocation7], 1024   ;;  %p1730_p0 = pmov %p1729_p13 }
  0x8e   : > { %s257_s0 = sand.u32 1, %s1167_s19   ;;  %p1731_p7 = scmp.ne.s32.totalorder %s1717_s21, 0 }
  0x8f   : > { %1140 = vsyncadd (%p1730_p0), [#allocation7], 4294966272  ;;  %s696_s12 = sshll.u32 %s257_s0, 6 }
  0x90   : > { %s1545_s8 = scalar_lea.vmem [#allocation8], %s696_s12 }
  0x91   : > { %1142 = dma.done.wait (%p1731_p7), %s243_s11, 1024  }
  0x92   : > { %1144 = vsyncadd (%p1731_p7), %s243_s11, 4294966272  ;;  %s1732_s5 = sld [smem:[#allocation16_spill]]  ;;  %s289_s10 = sand.u32 1, %s1155_s16  }
  0x93   : > { %s1555_s29 = sshll.u32 %s289_s10, 3  ;;  %s1733_s30 = sld [smem:[#allocation26_spill]] }
  0x94   : > { %s291_s6 = scalar_lea.vmem [#allocation9], %s1555_s29 }
  0x98   : > { %p293_p1 = scmp.lt.s32.totalorder %s1732_s5, 1  ;;  %p698_p3 = scmp.ne.s32.totalorder %s1732_s5, 0 }
  0x99   : > { %v944_v0 = vld [vmem:[#allocation6] sm:$0xff] (!%p698_p3)   ;;  %v1211_v1 = vmov (!%p698_p3), 0.0   ;;  %v945_v2 = vld [vmem:[#allocation6 + $0x8] sm:$0xff] (!%p698_p3)   ;;  %vm1212_vm0 = vmmov (!%p698_p3), 0   ;;  %v946_v3 = vld [vmem:[#allocation6 + $0x10] sm:$0xff] (!%p698_p3)  }
  0x9a   : > { %s1558_s4 = scalar_select %p293_p1, %s1732_s5, 1 }
  0x9b   : > { %301 = sbr.rel (%p698_p3) target bundleno = 406 (0x196), region = 52  ;;  %752 = vmatprep.subr.bf16.mxu0 (!%p698_p3), %v1211_v1  ;;  %768 = vmatprep.mubr.msk.bf16.mxu0 (!%p698_p3), %vm1212_vm0, %v1211_v1  ;;  %v947_v4 = vld [vmem:[#allocation6 + $0x18] sm:$0xff] (!%p698_p3)   ;;  %v948_v5 = vld [vmem:[#allocation6 + $0x20] sm:$0xff] (!%p698_p3)   ;;  %v949_v6 = vld [vmem:[#allocation6 + $0x28] sm:$0xff] (!%p698_p3)  }
  0x9c   : > { %s295_s14 = scalar_lea.vmem %s1733_s30, %s1558_s4  ;;  %753 = vmatpush3.bf16.msra.mxu0 (!%p698_p3), %v944_v0  ;;  %v950_v7 = vld [vmem:[#allocation6 + $0x30] sm:$0xff] (!%p698_p3)   ;;  %v951_v8 = vld [vmem:[#allocation6 + $0x38] sm:$0xff] (!%p698_p3)  }
  0x9d   : > { %754 = vmatprep.subr.bf16.mxu0 (!%p698_p3), %v1211_v1  ;;  %v952_v9 = vld [vmem:[%s246_s9] sm:$0xff] (!%p698_p3)  }
  0xa0   : > { %755 = vmatpush3.bf16.msra.mxu0 (!%p698_p3), %v945_v2 }
  0xa1   : > { %756 = vmatprep.subr.bf16.mxu0 (!%p698_p3), %v1211_v1 }
  0xa4   : > { %757 = vmatpush3.bf16.msra.mxu0 %v946_v3 }
  0xa5   : > { %758 = vmatprep.subr.bf16.mxu0 %v1211_v1 }
  0xa8   : > { %759 = vmatpush3.bf16.msra.mxu0 %v947_v4 }
  0xa9   : > { %760 = vmatprep.subr.bf16.mxu0 %v1211_v1 }
  0xac   : > { %761 = vmatpush3.bf16.msra.mxu0 %v948_v5 }
  0xad   : > { %762 = vmatprep.subr.bf16.mxu0 %v1211_v1 }
  0xb0   : > { %763 = vmatpush3.bf16.msra.mxu0 %v949_v6 }
  0xb1   : > { %764 = vmatprep.subr.bf16.mxu0 %v1211_v1 }
  0xb4   : > { %765 = vmatpush3.bf16.msra.mxu0 %v950_v7 }
  0xb5   : > { %766 = vmatprep.subr.bf16.mxu0 %v1211_v1 }
  0xb8   : > { %767 = vmatpush3.bf16.msra.mxu0 %v951_v8 }
  0xbb   : > { %769 = vmatmul.mubr.bf16.vlgmr.msra.gmra.mrb[0].mxu0 %v952_v9 }
 0x18e   : > { %v408_v10 = vpop.f32.mrb[0].mxu0 }
 0x18f   : > { %v770_v11 = vpop.f32.mrb[1].mxu0  ;;  %v415_v13 = vmul.f32 0.088388346, %v408_v10 }
 0x190   : > { %v411_v12 = vpop.f32.mrb[2].mxu0 }
 0x191   : > { %v416_v14 = vmul.f32 0.088388346, %v411_v12  ;;  %v771_v15 = vpop.f32.mrb[3].mxu0 }
 0x193   : > { %v417_v16 = vpack.c.bf16 %v416_v14, %v415_v13 }
 0x195   : > { %418 = vst [vmem:[#allocation2] sm:$0xff] %v417_v16 }
 0x196 PF: > { %v953_v17 = vld [vmem:[%s1545_s8] sm:$0xff]   ;;  %v1213_v18 = vmov 0.0   ;;  %v954_v19 = vld [vmem:[%s1545_s8 + $0x8] sm:$0xff]   ;;  %vm1214_vm1 = vmmov 0   ;;  %v955_v20 = vld [vmem:[%s1545_s8 + $0x10] sm:$0xff]   ;;  %s1734_s21 = sld [smem:[#allocation17_spill]] }
 0x197   : > { %772 = vmatprep.subr.bf16.mxu0 %v1213_v18  ;;  %788 = vmatprep.mubr.msk.bf16.mxu0 %vm1214_vm1, %v1213_v18  ;;  %v956_v21 = vld [vmem:[%s1545_s8 + $0x18] sm:$0xff]   ;;  %s1735_s27 = sld [smem:[#allocation16_spill]]  ;;  %v957_v22 = vld [vmem:[%s1545_s8 + $0x20] sm:$0xff]   ;;  %v958_v23 = vld [vmem:[%s1545_s8 + $0x28] sm:$0xff]   ;;  %s558_s9 = sshll.u32 %s291_s6, 4  ;;  %s1590_s9 = int_to_ptr.vmem [resolvable:$true] %s558_s9 }
 0x198   : > { %773 = vmatpush3.bf16.msra.mxu0 %v953_v17  ;;  %v959_v24 = vld [vmem:[%s1545_s8 + $0x30] sm:$0xff]   ;;  %v960_v25 = vld [vmem:[%s1545_s8 + $0x38] sm:$0xff]   ;;  %v708_v27 = vld [vmem:[%s295_s14] ss:$0 sm:$0xff]  ;;  %s1737_s8 = sld [smem:[#allocation27_spill]]  ;;  %s1596_s4 = scalar_lea.sflag [#allocation5], %s289_s10 }
 0x199   : > { %774 = vmatprep.subr.bf16.mxu0 %v1213_v18  ;;  %s1049_s20 = scalar_lea.vmem %s1590_s9, 128  ;;  %p1738_p9 = scmp.ne.s32.totalorder %s1718_s18, 0 }
 0x19a   : > { %p1050_p11 = scmp.ne.s32.totalorder %s1590_s9, %s1049_s20  ;;  %s1215_s23 = smov [#allocation9]  }
 0x19b   : > { %s1053_s30 = sshll.u32 %s1215_s23, 4  ;;  %s1054_s30 = int_to_ptr.vmem [resolvable:$false] %s1053_s30 }
 0x19c   : > { %775 = vmatpush3.bf16.msra.mxu0 %v954_v19  ;;  %v419_v26 = vld [vmem:[#allocation2] sm:$0xff]  ;;  %s728_s26 = sshll.u32 %s1734_s21, 2  ;;  %p1051_p12 = pnand %p1050_p11, %p1738_p9 }
 0x19d   : > { %776 = vmatprep.subr.bf16.mxu0 %v1213_v18  ;;  %s555_s13 = sadd.s32 %s1735_s27, %s728_s26  ;;  %s1055_s14 = scalar_lea.vmem %s1054_s30, 256 }
 0x19e   : > { %s722_s11 = sshll.u32 %s555_s13, 6  ;;  %p1052_p6 = pneg %p1051_p12 }
 0x19f   : > { %s1588_s5 = scalar_lea.hbm %s1737_s8, %s722_s11  ;;  %p1056_p5 = scmp.lt.s32.totalorder %s1590_s9, %s1054_s30 }
 0x1a0   : > { %777 = vmatpush3.bf16.msra.mxu0 %v955_v20  ;;  %p1057_p4 = scmp.lt.s32.totalorder %s1055_s14, %s1049_s20 }
 0x1a1   : > { %778 = vmatprep.subr.bf16.mxu0 %v1213_v18 }
 0x1a2   : > { %p1058_p10 = por %p1057_p4, %p1056_p5 }
 0x1a4   : > { %779 = vmatpush3.bf16.msra.mxu0 %v956_v21  ;;  %p1059_p8 = pnand %p1058_p10, %p1052_p6 }
 0x1a5   : > { %780 = vmatprep.subr.bf16.mxu0 %v1213_v18 }
 0x1a8   : > { %781 = vmatpush3.bf16.msra.mxu0 %v957_v22 }
 0x1a9   : > { %782 = vmatprep.subr.bf16.mxu0 %v1213_v18 }
 0x1ac   : > { %783 = vmatpush3.bf16.msra.mxu0 %v958_v23 }
 0x1ad   : > { %784 = vmatprep.subr.bf16.mxu0 %v1213_v18 }
 0x1b0   : > { %785 = vmatpush3.bf16.msra.mxu0 %v959_v24 }
 0x1b1   : > { %786 = vmatprep.subr.bf16.mxu0 %v1213_v18 }
 0x1b4   : > { %787 = vmatpush3.bf16.msra.mxu0 %v960_v25 }
 0x1b7   : > { %789 = vmatmul.mubr.bf16.vlgmr.msra.gmra.mrb[0].mxu0 %v419_v26 }
 0x28a   : > { %v525_v28 = vpop.f32.mrb[0].mxu0 }
 0x28b   : > { %v790_v29 = vpop.f32.mrb[1].mxu0  ;;  %v526_v31 = vadd.f32 %v708_v27, %v525_v28 }
 0x28c   : > { %v528_v30 = vpop.f32.mrb[2].mxu0 }
 0x28d   : > { %v529_v32 = vadd.f32 %v708_v27, %v528_v30  ;;  %v791_v33 = vpop.f32.mrb[3].mxu0 }
 0x28f   : > { %v732_v34 = vpack.c.bf16 %v529_v32, %v526_v31 }
 0x291   : > { %733 = vst [vmem:[%s291_s6] sm:$0xff] %v732_v34  }
 0x292   : > { %1062 = shalt.err (!%p1059_p8)
}
 0x293   : > { %s1063_s10 = scalar_lea.hbm %s1588_s5, 128  ;;  %s1067_s21 = scalar_lea.hbm %s1737_s8, 1024 }
 0x294   : > { %p1064_p2 = scmp.ne.s32.totalorder %s1588_s5, %s1063_s10  ;;  %p1068_p7 = scmp.lt.u32.totalorder %s1588_s5, %s1737_s8 }
 0x295   : > { %p1069_p1 = scmp.lt.u32.totalorder %s1067_s21, %s1063_s10  ;;  %p1071_p11 = scmp.lt.u32.totalorder %s1063_s10, %s1588_s5 }
 0x296   : > { %p1065_p13 = pnand %p1064_p2, %p1738_p9 }
 0x297   : > { %p1070_p3 = por %p1069_p1, %p1068_p7 }
 0x298   : > { %p1066_p0 = pneg %p1065_p13 }
 0x299   : > { %p1072_p12 = por %p1071_p11, %p1070_p3 }
 0x29b   : > { %p1073_p6 = pnand %p1072_p12, %p1066_p0 }
 0x29d   : > { %1076 = shalt.err (!%p1073_p6)
}
 0x29e   : > { %s1216_s13 = smov 64   ;;  %s1217_s25 = smov 128  }
 0x29f   : > { %s1218_s3 = smov 4  }
 0x2a0   : > { %800 = dma.vmem_to_hbm [thread:$0]  (%p1738_p9), %s1590_s9, 128, %s1588_s5, %s1596_s4, %s1216_s13, %s1217_s25, %s1218_s3  }
 0x2a1 PF: > { %p820_p5 = scmp.ge.s32.totalorder %s1203_s28, 2  ;;  %s573_s24 = sand.u32 1, %s1151_s15  }
 0x2a2   : > { %p1739_p4 = scmp.ne.s32.totalorder %s1719_s7, 0  ;;  %s574_s11 = scalar_lea.sflag [#allocation5], %s573_s24 }
 0x2a4   : > { %p814_p10 = pnand %p820_p5, %p1739_p4 }
 0x2a6   : > { %1146 = dma.done.wait (!%p814_p10), %s574_s11, 128  }
 0x2a7   : > { %1148 = vsyncadd (!%p814_p10), %s574_s11, 4294967168  ;;  %s21_s28 = sadd.s32 1, %s1203_s28   ;;  %s1741_s18 = sld [smem:[#allocation23_spill]] }
 0x2a8   : > { %p1625_p8 = scmp.ge.s32.totalorder %s21_s28, 10   ;;  %s1742_s9 = sld [smem:[#allocation14_spill]] }
 0x2a9   : > { %s1743_s20 = sld [smem:[#allocation24_spill]]  ;;  %s1744_s12 = sld [smem:[#allocation15_spill]] }
 0x2aa   : > { %s1745_s23 = sld [smem:[#allocation22_spill]]  ;;  %s1746_s24 = sld [smem:[#allocation18_spill]] }
 0x2ab   : > { %s1747_s25 = sld [smem:[#allocation19_spill]]  ;;  %s1748_s26 = sld [smem:[#allocation20_spill]] }
 0x2ac   : > { %s1749_s27 = sld [smem:[#allocation21_spill]]  ;;  %s1750_s15 = smov %s1155_s16 }
 0x2ad   : > { %s1751_s16 = smov %s1159_s17  ;;  %s1752_s17 = smov %s1741_s18 }
 0x2ae   : > { %s1753_s18 = smov %s1167_s19  ;;  %s1754_s19 = smov %s1742_s9 }
 0x2af   : > { %s1755_s21 = smov %s1179_s22  ;;  %s1756_s22 = smov %s1744_s12 }
 0x2b0   :  { %20 = sbr.rel (!%p1625_p8) target bundleno = 15 (0xf), region = 103 }
 0x2b7   :  { %579 = vsyncpa [#allocation4], 1 }
 0x2b8   :  { %581 = vsyncpa [#allocation4 + $0x1], 1 }
 0x2b9   :  { %582 = vsyncpa [#allocation7], 1 }
 0x2ba   :  { %583 = vsyncpa [#allocation5], 1 }
 0x2bb   :  { %585 = vsyncpa [#allocation5 + $0x1], 1 }

</bundles_post_ra>
